<compile_context>
chip_gen: v6e
topology: v6e:2x2x1
jax: 0.10.0
libtpu: 0.0.40
codegen_flags: <defaults>
</compile_context>

<pallas_src>
import functools

import jax
import jax.numpy as jnp
from jax.experimental import pallas as pl
from jax.experimental.pallas import tpu as pltpu

DEFAULT_SMOOTH = 1e-6
LANES = 128
TILE_ROWS = 4096            # (4096, 128) f32 block = 2 MiB per input per buffer
SMALL_MAX_ROWS = TILE_ROWS  # inputs up to one block take the single-step path
NUM_SPLITS = 2              # leading "parallel" axis: 2 TCs on v7x, serial on v5e/v6e


# ----------------------------------------------------------------------------
# Kernels
# ----------------------------------------------------------------------------
def _dice_small_kernel(p_ref, t_ref, inter_ref, denom_ref):
    """Single-step path: whole (rows, 128) slab in VMEM, partial sums out."""
    p = p_ref[...].astype(jnp.float32)
    t = t_ref[...].astype(jnp.float32)
    inter_ref[...] = jnp.sum(p * t).reshape(1, 1)
    denom_ref[...] = jnp.sum(p + t).reshape(1, 1)   # sum(p) + sum(t) fused


def _dice_tiled_kernel(p_ref, t_ref, inter_ref, denom_ref, *,
                       steps_per_split, nblocks, rows_valid, tile_rows):
    """Streaming reduction; per-split (8,128) partial sums live in the output."""
    c = pl.program_id(0)                  # split index (parallel axis)
    i = pl.program_id(1)                  # step within split (arbitrary axis)
    b = c * steps_per_split + i           # logical global block index

    @pl.when(i == 0)
    def _():
        inter_ref[...] = jnp.zeros_like(inter_ref)
        denom_ref[...] = jnp.zeros_like(denom_ref)

    p = p_ref[...].astype(jnp.float32)
    t = t_ref[...].astype(jnp.float32)

    def accumulate(pv, tv):
        # Pure-VPU reduction of the tile down to one vreg per accumulator:
        # (tile_rows, 128) -> (tile_rows//8, 8, 128) -> sum over axis 0.
        prod = jnp.sum((pv * tv).reshape(-1, 8, LANES), axis=0)
        ssum = jnp.sum((pv + tv).reshape(-1, 8, LANES), axis=0)
        inter_ref[0] = inter_ref[0] + prod
        denom_ref[0] = denom_ref[0] + ssum

    full_blocks = rows_valid // tile_rows          # blocks fully in range
    total_logical = NUM_SPLITS * steps_per_split   # blocks the grid will visit

    if full_blocks >= total_logical:
        # Every visited block is fully in range: no masking anywhere.
        accumulate(p, t)
    else:
        # Steady state: unmasked accumulate (zero masking cost).
        @pl.when(b < full_blocks)
        def _():
            accumulate(p, t)

        # Ragged last real block and/or duplicate (clamped) blocks: mask.
        @pl.when(b >= full_blocks)
        def _():
            row = jax.lax.broadcasted_iota(jnp.int32, p.shape, 0) + b * tile_rows
            valid = row < rows_valid   # duplicate blocks (b >= nblocks) fully invalid
            accumulate(jnp.where(valid, p, 0.0), jnp.where(valid, t, 0.0))


# ----------------------------------------------------------------------------
# Wrapper
# ----------------------------------------------------------------------------
def dice_loss(pred, target, smooth=DEFAULT_SMOOTH):
    assert pred.shape == target.shape
    smooth = float(smooth)

    # view(-1): reshape of a contiguous array is metadata-only (no HBM copy).
    # The f32 cast happens inside the kernel after the load.
    p = pred.reshape(-1)
    t = target.reshape(-1)
    n = p.shape[0]
    n_main = (n // LANES) * LANES      # lane-aligned prefix handled by the kernel

    inter = jnp.float32(0.0)
    denom = jnp.float32(0.0)

    if n_main > 0:
        pm = p[:n_main] if n_main != n else p
        tm = t[:n_main] if n_main != n else t
        rows = n_main // LANES
        p2 = pm.reshape(rows, LANES)
        t2 = tm.reshape(rows, LANES)

        if rows <= SMALL_MAX_ROWS:
            # Small-input fast path: one call, full-array blocks in VMEM.
            i_out, d_out = pl.pallas_call(
                _dice_small_kernel,
                out_shape=(jax.ShapeDtypeStruct((1, 1), jnp.float32),
                           jax.ShapeDtypeStruct((1, 1), jnp.float32)),
                in_specs=[pl.BlockSpec(memory_space=pltpu.MemorySpace.VMEM),
                          pl.BlockSpec(memory_space=pltpu.MemorySpace.VMEM)],
                compiler_params=pltpu.CompilerParams(
                    vmem_limit_bytes=32 * 1024 * 1024),
            )(p2, t2)
            inter = inter + i_out[0, 0]
            denom = denom + d_out[0, 0]
        else:
            # Large-input path: pipelined streaming reduction, 2-way core split.
            nblocks = pl.cdiv(rows, TILE_ROWS)
            steps_per_split = pl.cdiv(nblocks, NUM_SPLITS)

            def in_map(c, i):
                # Clamp duplicate trailing blocks into range; the kernel masks
                # their contribution to zero.
                return (jnp.minimum(c * steps_per_split + i, nblocks - 1), 0)

            kernel = functools.partial(
                _dice_tiled_kernel,
                steps_per_split=steps_per_split,
                nblocks=nblocks,
                rows_valid=rows,
                tile_rows=TILE_ROWS,
            )
            inter_p, denom_p = pl.pallas_call(
                kernel,
                out_shape=(
                    jax.ShapeDtypeStruct((NUM_SPLITS, 8, LANES), jnp.float32),
                    jax.ShapeDtypeStruct((NUM_SPLITS, 8, LANES), jnp.float32),
                ),
                grid_spec=pltpu.PrefetchScalarGridSpec(
                    num_scalar_prefetch=0,
                    grid=(NUM_SPLITS, steps_per_split),
                    in_specs=[
                        pl.BlockSpec((TILE_ROWS, LANES), in_map),
                        pl.BlockSpec((TILE_ROWS, LANES), in_map),
                    ],
                    out_specs=[
                        pl.BlockSpec((1, 8, LANES), lambda c, i: (c, 0, 0)),
                        pl.BlockSpec((1, 8, LANES), lambda c, i: (c, 0, 0)),
                    ],
                ),
                compiler_params=pltpu.CompilerParams(
                    dimension_semantics=("parallel", "arbitrary"),
                    vmem_limit_bytes=40 * 1024 * 1024,
                ),
            )(p2, t2)
            inter = inter + jnp.sum(inter_p)
            denom = denom + jnp.sum(denom_p)

    if n_main != n:
        # <128-element lane tail folded in with plain JAX (negligible work).
        pt = p[n_main:].astype(jnp.float32)
        tt = t[n_main:].astype(jnp.float32)
        inter = inter + jnp.sum(pt * tt)
        denom = denom + jnp.sum(pt + tt)

    dice = (2.0 * inter + smooth) / (denom + smooth)
    return 1.0 - dice


# ----------------------------------------------------------------------------
# Pure-JAX reference
# ----------------------------------------------------------------------------
def dice_loss_ref(pred, target, smooth=DEFAULT_SMOOTH):
    p = pred.reshape(-1).astype(jnp.float32)
    t = target.reshape(-1).astype(jnp.float32)
    inter = jnp.sum(p * t)
    dice = (2.0 * inter + smooth) / (jnp.sum(p) + jnp.sum(t) + smooth)
    return 1.0 - dice


if __name__ == "__main__":
    key = jax.random.PRNGKey(0)
    k1, k2, k3, k4, k5, k6, k7, k8 = jax.random.split(key, 8)

    # Primary case: NCHW (2, 4, 16, 16) — exercises the single-step fast path.
    pred = jax.nn.sigmoid(jax.random.normal(k1, (2, 4, 16, 16), dtype=jnp.float32))
    target = (jax.random.uniform(k2, (2, 4, 16, 16)) > 0.5).astype(jnp.float32)
    loss = jax.block_until_ready(dice_loss(pred, target))
    ref = jax.block_until_ready(dice_loss_ref(pred, target))
    assert jnp.allclose(loss, ref, rtol=1e-5, atol=1e-6), (loss, ref)

    # Large aligned case: 16384 rows -> tiled path, no masking branch.
    pred_l = jax.nn.sigmoid(jax.random.normal(k3, (8, 4, 256, 256), dtype=jnp.float32))
    target_l = (jax.random.uniform(k4, (8, 4, 256, 256)) > 0.5).astype(jnp.float32)
    loss_l = jax.block_until_ready(dice_loss(pred_l, target_l))
    ref_l = jax.block_until_ready(dice_loss_ref(pred_l, target_l))
    assert jnp.allclose(loss_l, ref_l, rtol=1e-4, atol=1e-6), (loss_l, ref_l)

    # Ragged case: 12150 rows -> ragged last block + one duplicate masked block.
    pred_r = jax.nn.sigmoid(jax.random.normal(k5, (3, 4, 360, 360), dtype=jnp.float32))
    target_r = (jax.random.uniform(k6, (3, 4, 360, 360)) > 0.5).astype(jnp.float32)
    loss_r = jax.block_until_ready(dice_loss(pred_r, target_r))
    ref_r = jax.block_until_ready(dice_loss_ref(pred_r, target_r))
    assert jnp.allclose(loss_r, ref_r, rtol=1e-4, atol=1e-6), (loss_r, ref_r)

    # Lane-ragged case: n % 128 != 0 -> small path + wrapper-side tail fold-in.
    pred_t = jax.nn.sigmoid(jax.random.normal(k7, (2, 3, 17, 19), dtype=jnp.float32))
    target_t = (jax.random.uniform(k8, (2, 3, 17, 19)) > 0.5).astype(jnp.float32)
    loss_t = jax.block_until_ready(dice_loss(pred_t, target_t))
    ref_t = jax.block_until_ready(dice_loss_ref(pred_t, target_t))
    assert jnp.allclose(loss_t, ref_t, rtol=1e-5, atol=1e-6), (loss_t, ref_t)

    print("KERNEL_OK")
</pallas_src>

<mosaic_0001>
module attributes {stable_mosaic.version = 11 : i64} {
  func.func @_dice_small_kernel(%arg0: memref<16x128xf32, #tpu.memory_space<vmem>>, %arg1: memref<16x128xf32, #tpu.memory_space<vmem>>, %arg2: memref<1x1xf32, #tpu.memory_space<vmem>>, %arg3: memref<1x1xf32, #tpu.memory_space<vmem>>) attributes {dimension_semantics = [], scalar_prefetch = 0 : i64, scratch_operands = 0 : i64, tpu.core_type = #tpu.core_type<tc>} {
    %c0 = arith.constant 0 : index
    %c0_0 = arith.constant 0 : index
    %0 = vector.load %arg0[%c0, %c0_0] : memref<16x128xf32, #tpu.memory_space<vmem>>, vector<16x128xf32>
    %c0_1 = arith.constant 0 : index
    %c0_2 = arith.constant 0 : index
    %1 = vector.load %arg1[%c0_1, %c0_2] : memref<16x128xf32, #tpu.memory_space<vmem>>, vector<16x128xf32>
    %2 = arith.mulf %0, %1 : vector<16x128xf32>
    %3 = vector.shape_cast %2 : vector<16x128xf32> to vector<1x16x128xf32>
    %cst = arith.constant dense<0.000000e+00> : vector<1xf32>
    %4 = vector.multi_reduction <add>, %3, %cst [1, 2] : vector<1x16x128xf32> to vector<1xf32>
    %5 = vector.shape_cast %4 : vector<1xf32> to vector<1x1x1xf32>
    %6 = vector.extract %5[0, 0, 0] : f32 from vector<1x1x1xf32>
    %7 = vector.broadcast %6 : f32 to vector<1x1xf32>
    %c0_3 = arith.constant 0 : index
    %c0_4 = arith.constant 0 : index
    %8 = vector.load %arg2[%c0_3, %c0_4] : memref<1x1xf32, #tpu.memory_space<vmem>>, vector<1x1xf32>
    tpu.vector_store %arg2[%c0_3, %c0_4], %7 {strides = array<i32>} : memref<1x1xf32, #tpu.memory_space<vmem>>, vector<1x1xf32>,
    %9 = arith.addf %0, %1 : vector<16x128xf32>
    %10 = vector.shape_cast %9 : vector<16x128xf32> to vector<1x16x128xf32>
    %cst_5 = arith.constant dense<0.000000e+00> : vector<1xf32>
    %11 = vector.multi_reduction <add>, %10, %cst_5 [1, 2] : vector<1x16x128xf32> to vector<1xf32>
    %12 = vector.shape_cast %11 : vector<1xf32> to vector<1x1x1xf32>
    %13 = vector.extract %12[0, 0, 0] : f32 from vector<1x1x1xf32>
    %14 = vector.broadcast %13 : f32 to vector<1x1xf32>
    %c0_6 = arith.constant 0 : index
    %c0_7 = arith.constant 0 : index
    %15 = vector.load %arg3[%c0_6, %c0_7] : memref<1x1xf32, #tpu.memory_space<vmem>>, vector<1x1xf32>
    tpu.vector_store %arg3[%c0_6, %c0_7], %14 {strides = array<i32>} : memref<1x1xf32, #tpu.memory_space<vmem>>, vector<1x1xf32>,
    return
  }
}

</mosaic_0001>

<bundles_post_ra>
// kernel: tpu_custom_call.1
= control target key start
LH: loop header
LB: loop body
LE: loop exit
PB: predicated region body
PF: predicated region fallthrough
CT: control target
= control target key end

     0   :  { %9 = vsyncpa [#allocation3], 0  ;;  %s244_s0 = inlined_call_operand.hbm [shape: f32[16,128], index: 0, kind: input, shape index: {}]   ;;  %s245_s1 = inlined_call_operand.hbm [shape: f32[16,128], index: 1, kind: input, shape index: {}]   ;;  %s246_s2 = inlined_call_operand.hbm [shape: f32[1,1], index: 2, kind: output, shape index: {0}]   ;;  %s247_s3 = inlined_call_operand.hbm [shape: f32[1,1], index: 3, kind: output, shape index: {1}]  }
   0x1   :  { %10 = vsyncpa [#allocation6], 0 }
   0x2   :  { %11 = vsyncpa [#allocation4], 0 }
   0x3   :  { %12 = vsyncpa [#allocation9], 0  ;;  %s204_s12 = smov [#allocation2]  }
   0x4   :  { %s18_s13 = sshll.u32 %s204_s12, 4  ;;  %s19_s13 = int_to_ptr.vmem [resolvable:$true] %s18_s13 }
   0x5   :  { %s124_s14 = scalar_lea.vmem %s19_s13, 256  ;;  %p129_p1 = scmp.lt.s32.totalorder %s19_s13, %s19_s13 }
   0x6   :  { %p125_p0 = scmp.ne.s32.totalorder %s19_s13, %s124_s14  ;;  %p130_p2 = scmp.lt.s32.totalorder %s124_s14, %s124_s14 }
   0x8   :  { %p131_p3 = por %p130_p2, %p129_p1 }
   0xa   :  { %p132_p4 = pnand %p131_p3, %p125_p0 }
   0xc   :  { %135 = shalt.err (!%p132_p4)
}
   0xd   :  { %s205_s15 = smov 128   ;;  %s206_s16 = smov 8  }
   0xe   :  { %24 = dma.hbm_to_vmem [thread:$0]  %s244_s0, 256, %s19_s13, [#allocation3], %s205_s15, %s205_s15, %s206_s16  }
   0xf   :  { %s207_s19 = smov [#allocation5]  }
  0x10   :  { %s30_s20 = sshll.u32 %s207_s19, 4  ;;  %s31_s20 = int_to_ptr.vmem [resolvable:$true] %s30_s20 }
  0x11   :  { %s144_s21 = scalar_lea.vmem %s31_s20, 256  ;;  %p149_p6 = scmp.lt.s32.totalorder %s31_s20, %s31_s20 }
  0x12   :  { %p145_p5 = scmp.ne.s32.totalorder %s31_s20, %s144_s21  ;;  %p150_p7 = scmp.lt.s32.totalorder %s144_s21, %s144_s21 }
  0x14   :  { %p151_p8 = por %p150_p7, %p149_p6 }
  0x16   :  { %p152_p9 = pnand %p151_p8, %p145_p5 }
  0x18   :  { %155 = shalt.err (!%p152_p9)
}
  0x19   :  { %36 = dma.hbm_to_vmem [thread:$0]  %s245_s1, 256, %s31_s20, [#allocation6], %s205_s15, %s205_s15, %s206_s16  }
  0x1a   :  { %196 = dma.done.wait [#allocation3], 256  }
  0x1b   :  { %197 = vsyncadd [#allocation3], 4294967040 }
  0x1c   :  { %198 = dma.done.wait [#allocation6], 256  }
  0x1d   :  { %199 = vsyncadd [#allocation6], 4294967040  ;;  %v43_v0 = vld [vmem:[#allocation2] sm:$0xff]  ;;  %v44_v1 = vld [vmem:[#allocation2 + $0x8] sm:$0xff]  ;;  %s208_s0 = smov [#allocation7]   ;;  %vm60_vm0 = vcmask 0  }
  0x1e   :  { %v45_v2 = vld [vmem:[#allocation5] sm:$0xff]  ;;  %v46_v3 = vld [vmem:[#allocation5 + $0x8] sm:$0xff]  ;;  %s82_s1 = sshll.u32 %s208_s0, 4  ;;  %s209_s25 = smov [#allocation8]   ;;  %s83_s1 = int_to_ptr.vmem [resolvable:$true] %s82_s1 }
  0x1f   :  { %v47_v4 = vmul.f32 %v45_v2, %v43_v0  ;;  %v48_v5 = vmul.f32 %v46_v3, %v44_v1  ;;  %v62_v6 = vadd.f32 %v45_v2, %v43_v0  ;;  %v63_v7 = vadd.f32 %v46_v3, %v44_v1  ;;  %s92_s26 = sshll.u32 %s209_s25, 4  ;;  %s156_s27 = scalar_lea.vmem %s83_s1, 16  ;;  %s93_s26 = int_to_ptr.vmem [resolvable:$true] %s92_s26 }
  0x20   :  { %p157_p10 = scmp.ne.s32.totalorder %s83_s1, %s156_s27  ;;  %s160_s28 = scalar_lea.vmem %s83_s1, 32 }
  0x21   :  { %v49_v8 = vadd.f32 %v48_v5, %v47_v4  ;;  %v64_v9 = vadd.f32 %v63_v7, %v62_v6  ;;  %p161_p11 = scmp.lt.s32.totalorder %s83_s1, %s83_s1  ;;  %p162_p12 = scmp.lt.s32.totalorder %s160_s28, %s156_s27 }
  0x23   :  { %50 = vadd.xlane.f32.xlu0 %v49_v8  ;;  %p163_p13 = por %p162_p12, %p161_p11 }
  0x25   :  { %p164_p0 = pnand %p163_p13, %p157_p10 }
  0x27   :  { %65 = vadd.xlane.f32.xlu0 %v64_v9 }
  0xac   :  { %v51_v10 = vpop.xlane.xlu0 %50 }
  0xad   :  { %v52_v11 = vrot.slane %v51_v10, 4 }
  0xaf   :  { %v53_v12 = vadd.f32 %v52_v11, %v51_v10 }
  0xb0   :  { %v66_v13 = vpop.xlane.xlu0 %65 }
  0xb1   :  { %v54_v14 = vrot.slane %v53_v12, 2  ;;  %v67_v15 = vrot.slane %v66_v13, 4 }
  0xb3   :  { %v68_v16 = vadd.f32 %v67_v15, %v66_v13  ;;  %v55_v17 = vadd.f32 %v54_v14, %v53_v12 }
  0xb5   :  { %v69_v18 = vrot.slane %v68_v16, 2  ;;  %v56_v19 = vrot.slane %v55_v17, 1 }
  0xb7   :  { %v70_v20 = vadd.f32 %v69_v18, %v68_v16  ;;  %v57_v21 = vadd.f32 %v56_v19, %v55_v17 }
  0xb9   :  { %106 = vpush %v57_v21  ;;  %v71_v22 = vrot.slane %v70_v20, 1 }
  0xbb   :  { %v72_v23 = vadd.f32 %v71_v22, %v70_v20 }
  0xbd   :  { %108 = vpush %v72_v23 }
  0xea   :  { %s107_s24 = spop %106 }
  0xeb   :  { %v59_v24 = vstv %s107_s24 }
  0xec   :  { %61 = vst.msk [vmem:[#allocation7] sm:$0x1] %vm60_vm0, %v59_v24 }
  0xed   :  { %167 = shalt.err (!%p164_p0)
}
  0xee   :  { %85 = dma.vmem_to_hbm [thread:$0]  %s83_s1, 16, %s246_s2, [#allocation4]  }
  0xef   :  { %s109_s4 = spop %108  ;;  %s176_s5 = scalar_lea.vmem %s93_s26, 16 }
  0xf0   :  { %v74_v25 = vstv %s109_s4  ;;  %p177_p1 = scmp.ne.s32.totalorder %s93_s26, %s176_s5  ;;  %s180_s6 = scalar_lea.vmem %s93_s26, 32 }
  0xf1   :  { %75 = vst.msk [vmem:[#allocation8] sm:$0x1] %vm60_vm0, %v74_v25  ;;  %p181_p2 = scmp.lt.s32.totalorder %s93_s26, %s93_s26  ;;  %p182_p3 = scmp.lt.s32.totalorder %s180_s6, %s176_s5 }
  0xf3   :  { %p183_p4 = por %p182_p3, %p181_p2 }
  0xf5   :  { %p184_p5 = pnand %p183_p4, %p177_p1 }
  0xf7   :  { %187 = shalt.err (!%p184_p5)
}
  0xf8   :  { %95 = dma.vmem_to_hbm [thread:$0]  %s93_s26, 16, %s247_s3, [#allocation9]  }
  0xf9   :  { %200 = dma.done.wait [#allocation4], 16  }
  0xfa   :  { %201 = vsyncadd [#allocation4], 4294967280 }
  0xfb   :  { %202 = dma.done.wait [#allocation9], 16  }
  0xfc   :  { %203 = vsyncadd [#allocation9], 4294967280 }
  0xfd   :  { %102 = vsyncpa [#allocation3], 1 }
  0xfe   :  { %103 = vsyncpa [#allocation6], 1 }
  0xff   :  { %104 = vsyncpa [#allocation4], 1 }
 0x100   :  { %105 = vsyncpa [#allocation9], 1 }

</bundles_post_ra>
